<compile_context>
chip_gen: v7x
topology: tpu7x:2x2x1
jax: 0.10.0
libtpu: 0.0.40
codegen_flags: <defaults>
</compile_context>

<pallas_src>
import jax
import jax.numpy as jnp
from jax.experimental import pallas as pl
from jax.experimental.pallas import tpu as pltpu

_LANE = 128          # vreg lane width
_F32_SUBLANE = 8     # f32 sublane count


def _normalize_kernel(x_ref, mean_ref, inv_sd_ref, o_ref):
    """o = (x - mean_row) * inv_sd_row for one (row_tile, col_tile) tile.

    mean_ref / inv_sd_ref are (row_tile, 1) float32 blocks holding exactly the
    rows of this tile; they broadcast across the lane dimension.
    """
    x = x_ref[...].astype(jnp.float32)
    o_ref[...] = ((x - mean_ref[...]) * inv_sd_ref[...]).astype(o_ref.dtype)


def _chip_config():
    """(usable_vmem_bytes, target_block_bytes) for the local TPU generation."""
    vmem_cap = 64 << 20          # conservative fallback = v7x per-TC VMEM
    try:
        vmem_cap = int(pltpu.get_tpu_info().vmem_capacity_bytes)
    except Exception:            # best-effort hardware query
        pass
    # Leave headroom for the compiler's internal scratch / spills.
    usable_vmem = vmem_cap - max(8 << 20, vmem_cap // 8)

    target_block_bytes = 8 << 20   # ~2.6 us DMA on v7x, ~6 us on v6e per block
    try:
        kind = jax.devices()[0].device_kind.lower()
        if "v5 lite" in kind or "v5lite" in kind or "v5e" in kind:
            # v5e: ~820 GB/s -> a 4 MiB block is already ~10 us per step, so the
            # ~0.35 us grid-step overhead is <4%; bigger blocks buy nothing.
            target_block_bytes = 4 << 20
    except Exception:
        pass
    return usable_vmem, target_block_bytes


def _pick_tiles(nc, hw, itemsize, sublane, usable_vmem, target_block_bytes):
    """Choose (row_tile, col_tile) for the (nc, hw) view."""
    # Column tile: keep full rows unless even one sublane-tile of rows would blow
    # the budget; otherwise split on a 128-lane multiple. The ragged last column
    # block (hw % 128 != 0) is handled by Pallas' masked writeback.
    if hw <= _LANE or hw * itemsize * sublane <= target_block_bytes:
        col_tile = hw
    else:
        col_tile = (target_block_bytes // (sublane * itemsize)) // _LANE * _LANE
        col_tile = max(_LANE, min(col_tile, (hw // _LANE) * _LANE))

    # Row tile: hit the block-size target while keeping the double-buffered
    # x/out blocks plus the two lane-padded (row_tile, 1) f32 stats blocks well
    # inside the usable VMEM.
    x_row_bytes = col_tile * itemsize
    per_row_vmem = 2 * (2 * x_row_bytes + 2 * _LANE * 4)  # 2 bufs * (x+out+2 stats)
    rows_by_target = max(1, target_block_bytes // x_row_bytes)
    rows_by_vmem = max(1, (usable_vmem - (4 << 20)) // per_row_vmem)
    row_tile = min(nc, rows_by_target, rows_by_vmem)
    if nc >= sublane:
        row_tile = max(sublane, (row_tile // sublane) * sublane)
    else:
        row_tile = nc   # block spans the whole (short) row axis — allowed.

    # Only force >=2 row steps when the grid would otherwise be a single step,
    # so both v7x TensorCores get work; on single-TC v5e/v6e this case means the
    # whole problem fits in one block, so the one extra step is negligible.
    if row_tile >= nc and col_tile >= hw and nc >= 2 * sublane:
        half = -(-nc // 2)
        row_tile = -(-half // sublane) * sublane

    return row_tile, col_tile


def normalize_layer(x, means, sds):
    """(x - mean_c) / sd_c per channel; x is an NCHW float array."""
    n, c, h, w = x.shape
    nc = n * c
    hw = h * w
    itemsize = jnp.dtype(x.dtype).itemsize
    # Dtype-aware sublane multiple: 8 rows (f32), 16 (bf16/f16), 32 (int8/fp8).
    sublane = _F32_SUBLANE * max(1, 4 // itemsize)

    usable_vmem, target_block_bytes = _chip_config()
    row_tile, col_tile = _pick_tiles(nc, hw, itemsize, sublane, usable_vmem,
                                     target_block_bytes)
    grid_rows = pl.cdiv(nc, row_tile)
    grid_cols = pl.cdiv(hw, col_tile)
    padded_nc = grid_rows * row_tile

    # Per-row statistics, float32 regardless of x.dtype (the kernel is HBM bound
    # so f32 math is free; this avoids bf16 rounding of 1/sd). The reciprocal is
    # taken here so the kernel does only sub + mul per element.
    means_f = jnp.asarray(means, dtype=jnp.float32)
    inv_sds_f = 1.0 / jnp.asarray(sds, dtype=jnp.float32)
    pad = padded_nc - nc
    # NOTE: rows >= nc are padding. The matching x rows of a ragged last block
    # are uninitialized VMEM, so those output rows are garbage — they are
    # discarded by Pallas' masked writeback; do not start trusting them.
    mean_rows = jnp.pad(jnp.tile(means_f, (n,)), (0, pad)).reshape(padded_nc, 1)
    inv_sd_rows = jnp.pad(jnp.tile(inv_sds_f, (n,)), (0, pad)).reshape(padded_nc, 1)

    x2d = x.reshape(nc, hw)

    out = pl.pallas_call(
        _normalize_kernel,
        out_shape=jax.ShapeDtypeStruct((nc, hw), x.dtype),
        grid_spec=pltpu.PrefetchScalarGridSpec(
            num_scalar_prefetch=0,
            grid=(grid_rows, grid_cols),
            in_specs=[
                pl.BlockSpec((row_tile, col_tile), lambda i, j: (i, j)),
                # Stats are blocked per row-tile: a few KiB of VMEM, re-DMA'd
                # only when the row block changes (negligible HBM traffic).
                pl.BlockSpec((row_tile, 1), lambda i, j: (i, 0)),
                pl.BlockSpec((row_tile, 1), lambda i, j: (i, 0)),
            ],
            out_specs=pl.BlockSpec((row_tile, col_tile), lambda i, j: (i, j)),
        ),
        compiler_params=pltpu.CompilerParams(
            dimension_semantics=("parallel", "parallel"),
            vmem_limit_bytes=int(usable_vmem),
        ),
    )(x2d, mean_rows, inv_sd_rows)

    return out.reshape(n, c, h, w)


if __name__ == "__main__":
    key = jax.random.PRNGKey(0)
    N, C, H, W = 2, 4, 16, 16

    x = jax.random.normal(key, (N, C, H, W), dtype=jnp.float32)

    # Deterministic "dataset statistics" (one per channel), as the module's
    # __init__ would receive.
    means = [0.485, 0.456, 0.406, 0.5]
    sds = [0.229, 0.224, 0.225, 0.25]

    out = normalize_layer(x, means, sds)
    out = jax.block_until_ready(out)

    # Reference check against plain-JAX broadcast semantics (NCHW).
    m = jnp.asarray(means, jnp.float32).reshape(1, C, 1, 1)
    s = jnp.asarray(sds, jnp.float32).reshape(1, C, 1, 1)
    ref = (x - m) / s
    assert out.shape == (N, C, H, W)
    assert jnp.allclose(out, ref, atol=1e-5, rtol=1e-5), float(
        jnp.max(jnp.abs(out - ref)))

    print("KERNEL_OK")
</pallas_src>

<mosaic_0001>
module attributes {stable_mosaic.version = 11 : i64} {
  func.func @_normalize_kernel(%arg0: i32, %arg1: i32, %arg2: memref<8x256xf32, #tpu.memory_space<vmem>>, %arg3: memref<8x1xf32, #tpu.memory_space<vmem>>, %arg4: memref<8x1xf32, #tpu.memory_space<vmem>>, %arg5: memref<8x256xf32, #tpu.memory_space<vmem>>) attributes {dimension_semantics = [#tpu.dimension_semantics<parallel>, #tpu.dimension_semantics<parallel>], iteration_bounds = array<i64: 1, 1>, scalar_prefetch = 0 : i64, scratch_operands = 0 : i64, tpu.core_type = #tpu.core_type<tc>, window_params = [{transform_indices = @transform_0, window_bounds = array<i64: 8, 256>}, {transform_indices = @transform_1, window_bounds = array<i64: 8, 1>}, {transform_indices = @transform_2, window_bounds = array<i64: 8, 1>}, {transform_indices = @transform_3, window_bounds = array<i64: 8, 256>}]} {
    %c0 = arith.constant 0 : index
    %c0_0 = arith.constant 0 : index
    %0 = vector.load %arg2[%c0, %c0_0] : memref<8x256xf32, #tpu.memory_space<vmem>>, vector<8x256xf32>
    %c0_1 = arith.constant 0 : index
    %c0_2 = arith.constant 0 : index
    %1 = vector.load %arg3[%c0_1, %c0_2] : memref<8x1xf32, #tpu.memory_space<vmem>>, vector<8x1xf32>
    %2 = vector.broadcast %1 : vector<8x1xf32> to vector<8x256xf32>
    %3 = arith.subf %0, %2 : vector<8x256xf32>
    %c0_3 = arith.constant 0 : index
    %c0_4 = arith.constant 0 : index
    %4 = vector.load %arg4[%c0_3, %c0_4] : memref<8x1xf32, #tpu.memory_space<vmem>>, vector<8x1xf32>
    %5 = vector.broadcast %4 : vector<8x1xf32> to vector<8x256xf32>
    %6 = arith.mulf %3, %5 : vector<8x256xf32>
    %c0_5 = arith.constant 0 : index
    %c0_6 = arith.constant 0 : index
    %7 = vector.load %arg5[%c0_5, %c0_6] : memref<8x256xf32, #tpu.memory_space<vmem>>, vector<8x256xf32>
    tpu.vector_store %arg5[%c0_5, %c0_6], %6 {strides = array<i32>} : memref<8x256xf32, #tpu.memory_space<vmem>>, vector<8x256xf32>,
    return
  }
  func.func @transform_0(%arg0: i32, %arg1: i32) -> (i32, i32) {
    %c0_i32 = arith.constant 0 : i32
    return %arg0, %arg1 : i32, i32
  }
  func.func @transform_1(%arg0: i32, %arg1: i32) -> (i32, i32) {
    %c0_i32 = arith.constant 0 : i32
    %c0_i32_0 = arith.constant 0 : i32
    return %arg0, %c0_i32 : i32, i32
  }
  func.func @transform_2(%arg0: i32, %arg1: i32) -> (i32, i32) {
    %c0_i32 = arith.constant 0 : i32
    %c0_i32_0 = arith.constant 0 : i32
    return %arg0, %c0_i32 : i32, i32
  }
  func.func @transform_3(%arg0: i32, %arg1: i32) -> (i32, i32) {
    %c0_i32 = arith.constant 0 : i32
    return %arg0, %arg1 : i32, i32
  }
}

</mosaic_0001>

<bundles_post_ra>
// kernel: tpu_custom_call.1
= control target key start
LH: loop header
LB: loop body
LE: loop exit
PB: predicated region body
PF: predicated region fallthrough
CT: control target
= control target key end

     0   :  { %s122_s0 = inlined_call_operand.vmem [shape: f32[8,256], index: 0, kind: input, shape index: {}]   ;;  %s123_s1 = inlined_call_operand.vmem [shape: f32[8,1], index: 1, kind: input, shape index: {}]   ;;  %s124_s2 = inlined_call_operand.vmem [shape: f32[8,1], index: 2, kind: input, shape index: {}]   ;;  %s125_s3 = inlined_call_operand.hbm [shape: f32[8,256], index: 3, kind: output, shape index: {}]  }
   0x1   :  { %v17_v0 = vld [vmem:[%s123_s1] sm:$0xff] }
   0x2   :  { %8 = vsyncpa [#allocation3], 0  ;;  %v76_v1 = vmov 0   ;;  %v25_v2 = vld [vmem:[%s124_s2] sm:$0xff]  ;;  %v16_v5 = vld [vmem:[%s122_s0 + $0x8] sm:$0xff]  ;;  %s77_s20 = smov [#allocation2]  }
   0x3   :  { %51 = vset.pattern.permute.xlu0 %v76_v1  ;;  %v15_v4 = vld [vmem:[%s122_s0] sm:$0xff]  ;;  %s41_s1 = sshll.u32 %s77_s20, 4  ;;  %s42_s1 = int_to_ptr.vmem [resolvable:$true] %s41_s1 }
   0x4   :  { %20 = vperm.xlu0 %51, %v17_v0   ;;  %s52_s2 = scalar_lea.vmem %s42_s1, 256  ;;  %p57_p1 = scmp.lt.s32.totalorder %s42_s1, %s42_s1 }
   0x5   :  { %p53_p0 = scmp.ne.s32.totalorder %s42_s1, %s52_s2  ;;  %p58_p2 = scmp.lt.s32.totalorder %s52_s2, %s52_s2 }
   0x7   :  { %p59_p3 = por %p58_p2, %p57_p1 }
   0x8   :  { %28 = vperm.xlu0 %51, %v25_v2  }
   0x9   :  { %p60_p4 = pnand %p59_p3, %p53_p0 }
  0x83   :  { %v21_v3 = vpop.permute.xlu0 %20 }
  0x84   :  { %v23_v6 = vsub.f32 %v15_v4, %v21_v3  ;;  %v24_v7 = vsub.f32 %v16_v5, %v21_v3 }
  0x87   :  { %v29_v8 = vpop.permute.xlu0 %28 }
  0x88   :  { %v31_v9 = vmul.f32 %v29_v8, %v23_v6  ;;  %v32_v10 = vmul.f32 %v29_v8, %v24_v7 }
  0x8a   :  { %33 = vst [vmem:[#allocation2] sm:$0xff] %v31_v9  ;;  %34 = vst [vmem:[#allocation2 + $0x8] sm:$0xff] %v32_v10 }
  0x8b   :  { %63 = shalt.err (!%p60_p4)
}
  0x8c   :  { %s64_s0 = scalar_lea.hbm %s125_s3, 256 }
  0x8d   :  { %p65_p5 = scmp.ne.s32.totalorder %s125_s3, %s64_s0  ;;  %p68_p6 = scmp.lt.u32.totalorder %s64_s0, %s125_s3 }
  0x8f   :  { %p70_p7 = pnand %p68_p6, %p65_p5 }
  0x91   :  { %73 = shalt.err (!%p70_p7)
}
  0x92   :  { %44 = dma.vmem_to_hbm [thread:$0]  %s42_s1, 256, %s125_s3, [#allocation3]  }
  0x93   :  { %74 = dma.done.wait [#allocation3], 256  }
  0x94   :  { %75 = vsyncadd [#allocation3], 4294967040 }
  0x95   :  { %48 = vsyncpa [#allocation3], 1 }

</bundles_post_ra>
